<compile_context>
chip_gen: v7x
topology: tpu7x:2x2x1
jax: 0.10.0
libtpu: 0.0.40
codegen_flags: <defaults>
</compile_context>

<pallas_src>
import functools

import numpy as np
import jax
import jax.numpy as jnp
from jax import lax
from jax.experimental import pallas as pl
from jax.experimental.pallas import tpu as pltpu


def _circulant_np(n):
    """C = I + S + S^T for circular shift S; (C @ v)[i] = v[i-1]+v[i]+v[i+1] (wrapping).

    For n < 3 the +1/-1 shifts coincide and are double counted, exactly like
    torch.roll in the reference -- do not 'fix' this.
    """
    eye = np.eye(n, dtype=np.float32)
    return eye + np.roll(eye, 1, axis=0) + np.roll(eye, -1, axis=0)


def _choose_bb(B, W):
    """How many boards to pack along the lane axis of one program.

    Preference: (1) lane occupancy of the padded-to-128 last dim,
    (2) >=2 grid steps so both v7x TensorCores get work, (3) smaller
    block-diagonal constant.  bb always divides B.
    """
    best_key, best_bb = None, 1
    for bb in range(1, B + 1):
        if B % bb:
            continue
        if bb > 1 and bb * W > 512:     # cap the (bb*W)^2 constant / contraction dim
            continue
        lanes = bb * W
        occ = lanes / (-(-lanes // 128) * 128)
        key = (round(occ, 3), (B // bb) >= 2, -bb)
        if best_key is None or key > best_key:
            best_key, best_bb = key, bb
    return best_bb


def _split3_bf16(v):
    """Split an f32 array into three bf16 terms whose sum is ~f32-accurate."""
    hi = v.astype(jnp.bfloat16)
    r1 = v - hi.astype(jnp.float32)
    mid = r1.astype(jnp.bfloat16)
    lo = (r1 - mid.astype(jnp.float32)).astype(jnp.bfloat16)
    return hi, mid, lo


def _dot_split_rhs(c_bf16, x_f32):
    """c_bf16 @ x_f32 at ~f32 accuracy with 3 bf16 MXU passes (board on RHS)."""
    hi, mid, lo = _split3_bf16(x_f32)
    return (jnp.dot(c_bf16, hi, preferred_element_type=jnp.float32)
            + jnp.dot(c_bf16, mid, preferred_element_type=jnp.float32)
            + jnp.dot(c_bf16, lo, preferred_element_type=jnp.float32))


def _dot_split_lhs(x_f32, c_bf16):
    """x_f32 @ c_bf16 at ~f32 accuracy with 3 bf16 MXU passes (board on LHS)."""
    hi, mid, lo = _split3_bf16(x_f32)
    return (jnp.dot(hi, c_bf16, preferred_element_type=jnp.float32)
            + jnp.dot(mid, c_bf16, preferred_element_type=jnp.float32)
            + jnp.dot(lo, c_bf16, preferred_element_type=jnp.float32))


def conway_kernel(x_ref, ch_ref, cblk_ref, o_ref, *, num_iterations):
    board0 = x_ref[...]        # (H, bb*W) f32 : bb boards side-by-side on lanes
    ch = ch_ref[...]           # (H, H)  bf16 circulant (entries {0,1,2}, exact)
    cblk = cblk_ref[...]       # (bb*W, bb*W) bf16 block-diag circulant (exact)

    def step(board):
        # Vertical 3-sum over rows i-1, i, i+1 (circular in H).
        col = _dot_split_rhs(ch, board)
        # Horizontal 3-sum within each board (block-diagonal => no cross-board mix).
        s = _dot_split_lhs(col, cblk)
        # s = 3x3 circular neighbourhood sum including the centre, so with
        # surround = s - board:
        #   clamp(surround + board - 2, 0, 1) - clamp(surround - 3, 0, 1)
        return jnp.clip(s - 2.0, 0.0, 1.0) - jnp.clip(s - board - 3.0, 0.0, 1.0)

    if num_iterations <= 16:
        out = board0
        for _ in range(num_iterations):
            out = step(out)
    else:
        out = lax.fori_loop(0, num_iterations, lambda _, v: step(v), board0,
                            unroll=8)

    o_ref[...] = out


def conv_regression_forward(inputs_para, num_iterations):
    """JAX/Pallas equivalent of ConvRegressionModule.forward(num_iterations).

    inputs_para: (N, C, H, W) float32 parameter (the module's self.inputs_para)
    """
    num_iterations = max(int(num_iterations), 1)   # torch forward always applies >=1 step
    N, C, H, W = inputs_para.shape
    B = N * C
    bb = _choose_bb(B, W)
    G = B // bb
    L = bb * W

    # Lane-major batch packing: (N,C,H,W) -> (G, H, bb*W), bb boards along lanes.
    x = inputs_para.astype(jnp.float32).reshape(G, bb, H, W)
    x = jnp.transpose(x, (0, 2, 1, 3)).reshape(G, H, L)

    c_h = _circulant_np(H)
    c_w = c_h if H == W else _circulant_np(W)            # shared constant when square
    c_blk = np.kron(np.eye(bb, dtype=np.float32), c_w)   # per-board W wrap
    ch_bf = jnp.asarray(c_h, dtype=jnp.bfloat16)         # exact in bf16
    cblk_bf = jnp.asarray(c_blk, dtype=jnp.bfloat16)

    kernel = functools.partial(conway_kernel, num_iterations=num_iterations)

    out = pl.pallas_call(
        kernel,
        out_shape=jax.ShapeDtypeStruct((G, H, L), jnp.float32),
        grid=(G,),
        in_specs=[
            pl.BlockSpec((pl.Squeezed(), H, L), lambda g: (g, 0, 0)),  # one group / program
            pl.BlockSpec((H, H), lambda g: (0, 0)),                    # resident constant
            pl.BlockSpec((L, L), lambda g: (0, 0)),                    # resident constant
        ],
        out_specs=pl.BlockSpec((pl.Squeezed(), H, L), lambda g: (g, 0, 0)),
        compiler_params=pltpu.CompilerParams(
            dimension_semantics=("parallel",),
        ),
    )(x, ch_bf, cblk_bf)

    out = out.reshape(G, H, bb, W).transpose(0, 2, 1, 3).reshape(N, C, H, W)
    return out


def _reference_forward(inputs_para, num_iterations):
    """Pure-JAX f32 reference (mirrors the PyTorch code with jnp.roll)."""
    def step(v):
        s = (jnp.roll(v, 1, 2) + jnp.roll(v, -1, 2)
             + jnp.roll(v, 1, 3) + jnp.roll(v, -1, 3)
             + jnp.roll(v, (-1, -1), (2, 3)) + jnp.roll(v, (1, -1), (2, 3))
             + jnp.roll(v, (-1, 1), (2, 3)) + jnp.roll(v, (1, 1), (2, 3)))
        return jnp.clip(s + v - 2.0, 0.0, 1.0) - jnp.clip(s - 3.0, 0.0, 1.0)

    out = inputs_para
    for _ in range(max(int(num_iterations), 1)):
        out = step(out)
    return out


if __name__ == "__main__":
    key = jax.random.PRNGKey(0)

    # Case 1: the module's default single board (1, 1, 25, 25).
    k1, k2 = jax.random.split(key)
    x1 = jax.random.uniform(k1, (1, 1, 25, 25), dtype=jnp.float32,
                            minval=0.4, maxval=0.6)
    out1 = jax.block_until_ready(conv_regression_forward(x1, 2))
    ref1 = _reference_forward(x1, 2)
    assert out1.shape == x1.shape
    err1 = float(jnp.max(jnp.abs(out1 - ref1)))
    assert err1 < 1e-4, f"single-board max abs err {err1}"

    # Case 2: batched boards, exercising lane packing + multi-group grid.
    x2 = jax.random.uniform(k2, (2, 4, 25, 25), dtype=jnp.float32,
                            minval=0.4, maxval=0.6)
    num_iterations = 4
    out2 = jax.block_until_ready(conv_regression_forward(x2, num_iterations))
    ref2 = _reference_forward(x2, num_iterations)
    assert out2.shape == x2.shape
    err2 = float(jnp.max(jnp.abs(out2 - ref2)))
    assert err2 < 1e-4, f"batched max abs err {err2}"

    print("KERNEL_OK")
</pallas_src>

<mosaic_0001>
module attributes {stable_mosaic.version = 11 : i64} {
  func.func @conway_kernel(%arg0: i32, %arg1: memref<1x25x25xf32, #tpu.memory_space<vmem>>, %arg2: memref<25x25xbf16, #tpu.memory_space<vmem>>, %arg3: memref<25x25xbf16, #tpu.memory_space<vmem>>, %arg4: memref<1x25x25xf32, #tpu.memory_space<vmem>>) attributes {dimension_semantics = [#tpu.dimension_semantics<parallel>], iteration_bounds = array<i64: 1>, scalar_prefetch = 0 : i64, scratch_operands = 0 : i64, tpu.core_type = #tpu.core_type<tc>, window_params = [{transform_indices = @transform_0, window_bounds = array<i64: 1, 25, 25>}, {pipeline_mode = #tpu.pipeline_mode<synchronous>, transform_indices = @transform_1, window_bounds = array<i64: 25, 25>}, {pipeline_mode = #tpu.pipeline_mode<synchronous>, transform_indices = @transform_2, window_bounds = array<i64: 25, 25>}, {transform_indices = @transform_3, window_bounds = array<i64: 1, 25, 25>}]} {
    %c0 = arith.constant 0 : index
    %c0_0 = arith.constant 0 : index
    %c0_1 = arith.constant 0 : index
    %0 = vector.load %arg1[%c0, %c0_0, %c0_1] : memref<1x25x25xf32, #tpu.memory_space<vmem>>, vector<1x25x25xf32>
    %1 = vector.shape_cast %0 : vector<1x25x25xf32> to vector<25x25xf32>
    %c0_2 = arith.constant 0 : index
    %c0_3 = arith.constant 0 : index
    %2 = vector.load %arg2[%c0_2, %c0_3] : memref<25x25xbf16, #tpu.memory_space<vmem>>, vector<25x25xbf16>
    %c0_4 = arith.constant 0 : index
    %c0_5 = arith.constant 0 : index
    %3 = vector.load %arg3[%c0_4, %c0_5] : memref<25x25xbf16, #tpu.memory_space<vmem>>, vector<25x25xbf16>
    %4 = arith.truncf %1 : vector<25x25xf32> to vector<25x25xbf16>
    %5 = arith.extf %4 : vector<25x25xbf16> to vector<25x25xf32>
    %6 = arith.subf %1, %5 : vector<25x25xf32>
    %7 = arith.truncf %6 : vector<25x25xf32> to vector<25x25xbf16>
    %8 = arith.extf %7 : vector<25x25xbf16> to vector<25x25xf32>
    %9 = arith.subf %6, %8 : vector<25x25xf32>
    %10 = arith.truncf %9 : vector<25x25xf32> to vector<25x25xbf16>
    %cst = arith.constant dense<0.000000e+00> : vector<25x25xf32>
    %11 = tpu.matmul %2, %4, %cst {dimension_numbers = #tpu.dot_dimension_numbers<[1], [0], [0], [1], [0, 0, 1, 1], [], []>} : vector<25x25xbf16>, vector<25x25xbf16>, vector<25x25xf32> -> vector<25x25xf32>
    %cst_6 = arith.constant dense<0.000000e+00> : vector<25x25xf32>
    %12 = tpu.matmul %2, %7, %cst_6 {dimension_numbers = #tpu.dot_dimension_numbers<[1], [0], [0], [1], [0, 0, 1, 1], [], []>} : vector<25x25xbf16>, vector<25x25xbf16>, vector<25x25xf32> -> vector<25x25xf32>
    %13 = arith.addf %11, %12 : vector<25x25xf32>
    %cst_7 = arith.constant dense<0.000000e+00> : vector<25x25xf32>
    %14 = tpu.matmul %2, %10, %cst_7 {dimension_numbers = #tpu.dot_dimension_numbers<[1], [0], [0], [1], [0, 0, 1, 1], [], []>} : vector<25x25xbf16>, vector<25x25xbf16>, vector<25x25xf32> -> vector<25x25xf32>
    %15 = arith.addf %13, %14 : vector<25x25xf32>
    %16 = arith.truncf %15 : vector<25x25xf32> to vector<25x25xbf16>
    %17 = arith.extf %16 : vector<25x25xbf16> to vector<25x25xf32>
    %18 = arith.subf %15, %17 : vector<25x25xf32>
    %19 = arith.truncf %18 : vector<25x25xf32> to vector<25x25xbf16>
    %20 = arith.extf %19 : vector<25x25xbf16> to vector<25x25xf32>
    %21 = arith.subf %18, %20 : vector<25x25xf32>
    %22 = arith.truncf %21 : vector<25x25xf32> to vector<25x25xbf16>
    %cst_8 = arith.constant dense<0.000000e+00> : vector<25x25xf32>
    %23 = tpu.matmul %16, %3, %cst_8 {dimension_numbers = #tpu.dot_dimension_numbers<[1], [0], [0], [1], [0, 0, 1, 1], [], []>} : vector<25x25xbf16>, vector<25x25xbf16>, vector<25x25xf32> -> vector<25x25xf32>
    %cst_9 = arith.constant dense<0.000000e+00> : vector<25x25xf32>
    %24 = tpu.matmul %19, %3, %cst_9 {dimension_numbers = #tpu.dot_dimension_numbers<[1], [0], [0], [1], [0, 0, 1, 1], [], []>} : vector<25x25xbf16>, vector<25x25xbf16>, vector<25x25xf32> -> vector<25x25xf32>
    %25 = arith.addf %23, %24 : vector<25x25xf32>
    %cst_10 = arith.constant dense<0.000000e+00> : vector<25x25xf32>
    %26 = tpu.matmul %22, %3, %cst_10 {dimension_numbers = #tpu.dot_dimension_numbers<[1], [0], [0], [1], [0, 0, 1, 1], [], []>} : vector<25x25xbf16>, vector<25x25xbf16>, vector<25x25xf32> -> vector<25x25xf32>
    %27 = arith.addf %25, %26 : vector<25x25xf32>
    %cst_11 = arith.constant 2.000000e+00 : f32
    %28 = vector.broadcast %cst_11 : f32 to vector<25x25xf32>
    %29 = arith.subf %27, %28 : vector<25x25xf32>
    %cst_12 = arith.constant 0.000000e+00 : f32
    %cst_13 = arith.constant 1.000000e+00 : f32
    %30 = vector.broadcast %cst_12 : f32 to vector<25x25xf32>
    %31 = arith.maximumf %30, %29 : vector<25x25xf32>
    %32 = vector.broadcast %cst_13 : f32 to vector<25x25xf32>
    %33 = arith.minimumf %32, %31 : vector<25x25xf32>
    %34 = arith.subf %27, %1 : vector<25x25xf32>
    %cst_14 = arith.constant 3.000000e+00 : f32
    %35 = vector.broadcast %cst_14 : f32 to vector<25x25xf32>
    %36 = arith.subf %34, %35 : vector<25x25xf32>
    %cst_15 = arith.constant 0.000000e+00 : f32
    %cst_16 = arith.constant 1.000000e+00 : f32
    %37 = vector.broadcast %cst_15 : f32 to vector<25x25xf32>
    %38 = arith.maximumf %37, %36 : vector<25x25xf32>
    %39 = vector.broadcast %cst_16 : f32 to vector<25x25xf32>
    %40 = arith.minimumf %39, %38 : vector<25x25xf32>
    %41 = arith.subf %33, %40 : vector<25x25xf32>
    %42 = arith.truncf %41 : vector<25x25xf32> to vector<25x25xbf16>
    %43 = arith.extf %42 : vector<25x25xbf16> to vector<25x25xf32>
    %44 = arith.subf %41, %43 : vector<25x25xf32>
    %45 = arith.truncf %44 : vector<25x25xf32> to vector<25x25xbf16>
    %46 = arith.extf %45 : vector<25x25xbf16> to vector<25x25xf32>
    %47 = arith.subf %44, %46 : vector<25x25xf32>
    %48 = arith.truncf %47 : vector<25x25xf32> to vector<25x25xbf16>
    %cst_17 = arith.constant dense<0.000000e+00> : vector<25x25xf32>
    %49 = tpu.matmul %2, %42, %cst_17 {dimension_numbers = #tpu.dot_dimension_numbers<[1], [0], [0], [1], [0, 0, 1, 1], [], []>} : vector<25x25xbf16>, vector<25x25xbf16>, vector<25x25xf32> -> vector<25x25xf32>
    %cst_18 = arith.constant dense<0.000000e+00> : vector<25x25xf32>
    %50 = tpu.matmul %2, %45, %cst_18 {dimension_numbers = #tpu.dot_dimension_numbers<[1], [0], [0], [1], [0, 0, 1, 1], [], []>} : vector<25x25xbf16>, vector<25x25xbf16>, vector<25x25xf32> -> vector<25x25xf32>
    %51 = arith.addf %49, %50 : vector<25x25xf32>
    %cst_19 = arith.constant dense<0.000000e+00> : vector<25x25xf32>
    %52 = tpu.matmul %2, %48, %cst_19 {dimension_numbers = #tpu.dot_dimension_numbers<[1], [0], [0], [1], [0, 0, 1, 1], [], []>} : vector<25x25xbf16>, vector<25x25xbf16>, vector<25x25xf32> -> vector<25x25xf32>
    %53 = arith.addf %51, %52 : vector<25x25xf32>
    %54 = arith.truncf %53 : vector<25x25xf32> to vector<25x25xbf16>
    %55 = arith.extf %54 : vector<25x25xbf16> to vector<25x25xf32>
    %56 = arith.subf %53, %55 : vector<25x25xf32>
    %57 = arith.truncf %56 : vector<25x25xf32> to vector<25x25xbf16>
    %58 = arith.extf %57 : vector<25x25xbf16> to vector<25x25xf32>
    %59 = arith.subf %56, %58 : vector<25x25xf32>
    %60 = arith.truncf %59 : vector<25x25xf32> to vector<25x25xbf16>
    %cst_20 = arith.constant dense<0.000000e+00> : vector<25x25xf32>
    %61 = tpu.matmul %54, %3, %cst_20 {dimension_numbers = #tpu.dot_dimension_numbers<[1], [0], [0], [1], [0, 0, 1, 1], [], []>} : vector<25x25xbf16>, vector<25x25xbf16>, vector<25x25xf32> -> vector<25x25xf32>
    %cst_21 = arith.constant dense<0.000000e+00> : vector<25x25xf32>
    %62 = tpu.matmul %57, %3, %cst_21 {dimension_numbers = #tpu.dot_dimension_numbers<[1], [0], [0], [1], [0, 0, 1, 1], [], []>} : vector<25x25xbf16>, vector<25x25xbf16>, vector<25x25xf32> -> vector<25x25xf32>
    %63 = arith.addf %61, %62 : vector<25x25xf32>
    %cst_22 = arith.constant dense<0.000000e+00> : vector<25x25xf32>
    %64 = tpu.matmul %60, %3, %cst_22 {dimension_numbers = #tpu.dot_dimension_numbers<[1], [0], [0], [1], [0, 0, 1, 1], [], []>} : vector<25x25xbf16>, vector<25x25xbf16>, vector<25x25xf32> -> vector<25x25xf32>
    %65 = arith.addf %63, %64 : vector<25x25xf32>
    %cst_23 = arith.constant 2.000000e+00 : f32
    %66 = vector.broadcast %cst_23 : f32 to vector<25x25xf32>
    %67 = arith.subf %65, %66 : vector<25x25xf32>
    %cst_24 = arith.constant 0.000000e+00 : f32
    %cst_25 = arith.constant 1.000000e+00 : f32
    %68 = vector.broadcast %cst_24 : f32 to vector<25x25xf32>
    %69 = arith.maximumf %68, %67 : vector<25x25xf32>
    %70 = vector.broadcast %cst_25 : f32 to vector<25x25xf32>
    %71 = arith.minimumf %70, %69 : vector<25x25xf32>
    %72 = arith.subf %65, %41 : vector<25x25xf32>
    %cst_26 = arith.constant 3.000000e+00 : f32
    %73 = vector.broadcast %cst_26 : f32 to vector<25x25xf32>
    %74 = arith.subf %72, %73 : vector<25x25xf32>
    %cst_27 = arith.constant 0.000000e+00 : f32
    %cst_28 = arith.constant 1.000000e+00 : f32
    %75 = vector.broadcast %cst_27 : f32 to vector<25x25xf32>
    %76 = arith.maximumf %75, %74 : vector<25x25xf32>
    %77 = vector.broadcast %cst_28 : f32 to vector<25x25xf32>
    %78 = arith.minimumf %77, %76 : vector<25x25xf32>
    %79 = arith.subf %71, %78 : vector<25x25xf32>
    %c0_29 = arith.constant 0 : index
    %c0_30 = arith.constant 0 : index
    %c0_31 = arith.constant 0 : index
    %80 = vector.load %arg4[%c0_29, %c0_30, %c0_31] : memref<1x25x25xf32, #tpu.memory_space<vmem>>, vector<1x25x25xf32>
    %81 = vector.shape_cast %80 : vector<1x25x25xf32> to vector<25x25xf32>
    %82 = vector.shape_cast %79 : vector<25x25xf32> to vector<1x25x25xf32>
    tpu.vector_store %arg4[%c0_29, %c0_30, %c0_31], %82 {strides = array<i32>} : memref<1x25x25xf32, #tpu.memory_space<vmem>>, vector<1x25x25xf32>,
    return
  }
  func.func @transform_0(%arg0: i32) -> (i32, i32, i32) {
    %c0_i32 = arith.constant 0 : i32
    %c0_i32_0 = arith.constant 0 : i32
    %c0_i32_1 = arith.constant 0 : i32
    return %arg0, %c0_i32, %c0_i32_0 : i32, i32, i32
  }
  func.func @transform_1(%arg0: i32) -> (i32, i32) {
    %c0_i32 = arith.constant 0 : i32
    %c0_i32_0 = arith.constant 0 : i32
    %c0_i32_1 = arith.constant 0 : i32
    return %c0_i32, %c0_i32_0 : i32, i32
  }
  func.func @transform_2(%arg0: i32) -> (i32, i32) {
    %c0_i32 = arith.constant 0 : i32
    %c0_i32_0 = arith.constant 0 : i32
    %c0_i32_1 = arith.constant 0 : i32
    return %c0_i32, %c0_i32_0 : i32, i32
  }
  func.func @transform_3(%arg0: i32) -> (i32, i32, i32) {
    %c0_i32 = arith.constant 0 : i32
    %c0_i32_0 = arith.constant 0 : i32
    %c0_i32_1 = arith.constant 0 : i32
    return %arg0, %c0_i32, %c0_i32_0 : i32, i32, i32
  }
}

</mosaic_0001>

<bundles_post_ra>
// kernel: tpu_custom_call.1
= control target key start
LH: loop header
LB: loop body
LE: loop exit
PB: predicated region body
PF: predicated region fallthrough
CT: control target
= control target key end

     0   :  { %vm66_vm0 = vcmask 1043456   ;;  %vm67_vm1 = vcmask 1044480   ;;  %v1106_v3 = vmov 65535   ;;  %vm59_vm2 = vcmask 203776   ;;  %s1283_s0 = inlined_call_operand.vmem [shape: f32[1,25,25], index: 0, kind: input, shape index: {}]   ;;  %s1284_s2 = inlined_call_operand.vmem [shape: bf16[25,25], index: 2, kind: input, shape index: {}]   ;;  %s1285_s1 = inlined_call_operand.vmem [shape: bf16[25,25], index: 1, kind: input, shape index: {}]   ;;  %s1286_s3 = inlined_call_operand.vmem [shape: f32[1,25,25], index: 3, kind: output, shape index: {}]  }
   0x1   :  { %v1130_v0 = vld [vmem:[%s1283_s0] sm:$0xff]  ;;  %v1135_v1 = vld [vmem:[%s1283_s0 + $0x8] sm:$0xff]  ;;  %v1140_v2 = vld [vmem:[%s1283_s0 + $0x10] sm:$0xff]  ;;  %v68_v4 = vsel %vm66_vm0, 4294967295, %v1106_v3  ;;  %vm875_vm3 = vcmask 196608  }
   0x2   :  { %v27_v5 = vpack.c.bf16 %v1135_v1, %v1130_v0  ;;  %v1147_v6 = vld [vmem:[%s1283_s0 + $0x18] sm:$0x1]  ;;  %v1154_v8 = vld [vmem:[%s1284_s2] sm:$0xff]   ;;  %v1103_v11 = vld [vmem:[%s1284_s2 + $0x8] sm:$0x1f]   ;;  %v1159_v14 = vsel %vm67_vm1, %v68_v4, 0 }
   0x3   :  { %v28_v7 = vpack.c.bf16 %v1147_v6, %v1140_v2  ;;  %v1164_v15 = vld [vmem:[%s1285_s1] sm:$0xff]   ;;  %997 = vmatprep.subr.bf16.mxu1 %v1154_v8  ;;  %v1170_v18 = vand.u32 %v1103_v11, %v1159_v14  ;;  %v1184_v26 = vld [vmem:[%s1285_s1 + $0x8] sm:$0x1f]  }
   0x4   :  { %v29_v9 = vunpack.c.l.bf16 %v27_v5  ;;  %v30_v10 = vunpack.c.h.bf16 %v27_v5  ;;  %998 = vmatpush3.bf16.msra.mxu1 %v1154_v8  ;;  %977 = vmatprep.mubr.msk.bf16.mxu0 %vm59_vm2, %v1164_v15 }
   0x5   :  { %v31_v12 = vunpack.c.l.bf16 %v28_v7  ;;  %v32_v13 = vunpack.c.h.bf16 %v28_v7  ;;  %999 = vmatprep.subr.bf16.mxu1 %v1170_v18  ;;  %v123_v27 = vand.u32 %v1159_v14, %v28_v7 }
   0x6   :  { %v33_v16 = vsub.f32 %v1130_v0, %v29_v9  ;;  %v34_v17 = vsub.f32 %v1135_v1, %v30_v10 }
   0x7   :  { %v35_v19 = vsub.f32 %v1140_v2, %v31_v12  ;;  %v36_v20 = vsub.f32 %v1147_v6, %v32_v13 }
   0x8   :  { %v37_v21 = vpack.c.bf16 %v34_v17, %v33_v16  ;;  %1000 = vmatpush3.bf16.msra.mxu1 %v1170_v18 }
   0x9   :  { %v38_v22 = vpack.c.bf16 %v36_v20, %v35_v19  ;;  %1005 = vmatprep.subr.bf16.mxu1 %v1154_v8 }
   0xa   :  { %973 = vmatprep.subr.bf16.mxu0 %v37_v21  ;;  %v39_v24 = vunpack.c.l.bf16 %v37_v21  ;;  %v40_v25 = vunpack.c.h.bf16 %v37_v21 }
   0xb   :  { %974 = vmatpush3.bf16.msra.mxu0 %v37_v21  ;;  %v71_v23 = vand.u32 %v1159_v14, %v38_v22  ;;  %v41_v30 = vunpack.c.l.bf16 %v38_v22  ;;  %v42_v31 = vunpack.c.h.bf16 %v38_v22 }
   0xc   :  { %v43_v28 = vsub.f32 %v33_v16, %v39_v24  ;;  %v44_v29 = vsub.f32 %v34_v17, %v40_v25 }
   0xd   :  { %975 = vmatprep.subr.bf16.mxu0 %v71_v23  ;;  %v45_v33 = vsub.f32 %v35_v19, %v41_v30  ;;  %v46_v34 = vsub.f32 %v36_v20, %v42_v31 }
   0xe   :  { %v47_v32 = vpack.c.bf16 %v44_v29, %v43_v28 }
   0xf   :  { %976 = vmatpush3.bf16.msra.mxu0 %v71_v23  ;;  %v48_v35 = vpack.c.bf16 %v46_v34, %v45_v33 }
  0x10   :  { %981 = vmatprep.subr.bf16.mxu0 %v27_v5 }
  0x11   :  { %v175_v36 = vand.u32 %v1159_v14, %v48_v35 }
  0x12   :  { %978 = vmatmul.mubr.msk.bf16.vlgmr.msra.gmra.mrb[0].mxu0 %vm59_vm2, %v1184_v26 }
  0x13   :  { %982 = vmatpush3.bf16.msra.mxu0 %v27_v5  ;;  %985 = vmatprep.mubr.msk.bf16.mxu0 %vm59_vm2, %v1164_v15 }
  0x14   :  { %983 = vmatprep.subr.bf16.mxu0 %v123_v27 }
  0x17   :  { %984 = vmatpush3.bf16.msra.mxu0 %v123_v27 }
  0x18   :  { %989 = vmatprep.subr.bf16.mxu0 %v47_v32 }
  0x1e   :  { %986 = vmatmul.mubr.msk.bf16.vlgmr.msra.gmra.mrb[0].mxu0 %vm59_vm2, %v1184_v26 }
  0x1f   :  { %990 = vmatpush3.bf16.msra.mxu0 %v47_v32  ;;  %993 = vmatprep.mubr.msk.bf16.mxu0 %vm59_vm2, %v1164_v15 }
  0x20   :  { %991 = vmatprep.subr.bf16.mxu0 %v175_v36 }
  0x23   :  { %992 = vmatpush3.bf16.msra.mxu0 %v175_v36 }
  0x2a   :  { %994 = vmatmul.mubr.msk.bf16.vlgmr.msra.gmra.mrb[0].mxu0 %vm59_vm2, %v1184_v26 }
  0x2b   :  { %1025 = vmatprep.mubr.msk.bf16.mxu0 %vm59_vm2, %v1164_v15 }
  0xfd   :  { %v995_v37 = vpop.f32.mrb[0].mxu0 }
  0xfe   :  { %v211_v38 = vpop.f32.mrb[1].mxu0 }
  0xff   :  { %v996_v39 = vpop.f32.mrb[2].mxu0 }
 0x100   :  { %v231_v40 = vpack.c.bf16 %v996_v39, %v995_v37  ;;  %v214_v41 = vpop.f32.mrb[3].mxu0 }
 0x101   :  { %v230_v42 = vpack.c.bf16 %v214_v41, %v211_v38 }
 0x102   :  { %v234_v43 = vunpack.c.l.bf16 %v231_v40  ;;  %v235_v44 = vunpack.c.h.bf16 %v231_v40 }
 0x103   :  { %v232_v45 = vunpack.c.l.bf16 %v230_v42  ;;  %v233_v46 = vunpack.c.h.bf16 %v230_v42 }
 0x104   :  { %v238_v47 = vsub.f32 %v995_v37, %v234_v43  ;;  %v239_v48 = vsub.f32 %v996_v39, %v235_v44 }
 0x105   :  { %v236_v49 = vsub.f32 %v211_v38, %v232_v45  ;;  %v237_v50 = vsub.f32 %v214_v41, %v233_v46 }
 0x106   :  { %v241_v51 = vpack.c.bf16 %v239_v48, %v238_v47 }
 0x107   :  { %v240_v52 = vpack.c.bf16 %v237_v50, %v236_v49 }
 0x108   :  { %v244_v53 = vunpack.c.l.bf16 %v241_v51  ;;  %v245_v54 = vunpack.c.h.bf16 %v241_v51 }
 0x109   :  { %v242_v55 = vunpack.c.l.bf16 %v240_v52  ;;  %v243_v56 = vunpack.c.h.bf16 %v240_v52  ;;  %1001 = vmatprep.mubr.msk.bf16.mxu1 %vm59_vm2, %v240_v52 }
 0x10a   :  { %v248_v57 = vsub.f32 %v238_v47, %v244_v53  ;;  %v249_v58 = vsub.f32 %v239_v48, %v245_v54  ;;  %1002 = vmatmul.mubr.msk.bf16.vlgmr.msra.gmra.mrb[0].mxu1 %vm59_vm2, %v241_v51 }
 0x10b   :  { %v246_v59 = vsub.f32 %v236_v49, %v242_v55  ;;  %v247_v60 = vsub.f32 %v237_v50, %v243_v56  ;;  %1006 = vmatpush3.bf16.msra.mxu1 %v1154_v8  ;;  %1009 = vmatprep.mubr.msk.bf16.mxu1 %vm59_vm2, %v230_v42 }
 0x10c   :  { %v251_v61 = vpack.c.bf16 %v249_v58, %v248_v57  ;;  %1007 = vmatprep.subr.bf16.mxu1 %v1170_v18 }
 0x10d   :  { %v250_v62 = vpack.c.bf16 %v247_v60, %v246_v59 }
 0x10f   :  { %1008 = vmatpush3.bf16.msra.mxu1 %v1170_v18 }
 0x110   :  { %1013 = vmatprep.subr.bf16.mxu1 %v1154_v8 }
 0x116   :  { %1010 = vmatmul.mubr.msk.bf16.vlgmr.msra.gmra.mrb[0].mxu1 %vm59_vm2, %v231_v40 }
 0x117   :  { %1014 = vmatpush3.bf16.msra.mxu1 %v1154_v8  ;;  %1017 = vmatprep.mubr.msk.bf16.mxu1 %vm59_vm2, %v250_v62 }
 0x118   :  { %1015 = vmatprep.subr.bf16.mxu1 %v1170_v18 }
 0x11b   :  { %1016 = vmatpush3.bf16.msra.mxu1 %v1170_v18 }
 0x11c   :  { %1045 = vmatprep.subr.bf16.mxu1 %v1154_v8 }
 0x122   :  { %1018 = vmatmul.mubr.msk.bf16.vlgmr.msra.gmra.mrb[0].mxu1 %vm59_vm2, %v251_v61 }
 0x123   :  { %1046 = vmatpush3.bf16.msra.mxu1 %v1154_v8 }
 0x124   :  { %1047 = vmatprep.subr.bf16.mxu1 %v1170_v18 }
 0x127   :  { %1048 = vmatpush3.bf16.msra.mxu1 %v1170_v18 }
 0x128   :  { %1053 = vmatprep.subr.bf16.mxu1 %v1154_v8 }
 0x1f5   :  { %v1019_v63 = vpop.f32.mrb[0].mxu1 }
 0x1f6   :  { %v899_v3 = vadd.f32 -2.0, %v1019_v63  ;;  %v449_v4 = vsub.f32 %v1019_v63, %v1140_v2  ;;  %v416_v5 = vpop.f32.mrb[1].mxu1 }
 0x1f7   :  { %v897_v7 = vadd.f32 -2.0, %v416_v5  ;;  %v447_v9 = vsub.f32 %v416_v5, %v1130_v0  ;;  %v1020_v10 = vpop.f32.mrb[2].mxu1 }
 0x1f8   :  { %v903_v11 = vadd.f32 -3.0, %v449_v4  ;;  %v900_v12 = vadd.f32 -2.0, %v1020_v10  ;;  %v450_v13 = vsub.f32 %v1020_v10, %v1147_v6  ;;  %v419_v16 = vpop.f32.mrb[3].mxu1  ;;  %v441_v21 = vmax.f32 %v899_v3, 0.0 }
 0x1f9   :  { %v901_v17 = vadd.f32 -3.0, %v447_v9  ;;  %v898_v19 = vadd.f32 -2.0, %v419_v16  ;;  %v448_v20 = vsub.f32 %v419_v16, %v1135_v1  ;;  %v439_v25 = vmax.f32 %v897_v7, 0.0 }
 0x1fa   :  { %v457_v22 = vmax.f32 %v903_v11, 0.0  ;;  %v442_v23 = vmax.f32 %v900_v12, 0.0  ;;  %v904_v24 = vadd.f32 -3.0, %v450_v13  ;;  %v445_v32 = vmin.f32 %v441_v21, 1.0 }
 0x1fb   :  { %v455_v2 = vmax.f32 %v901_v17, 0.0  ;;  %v440_v27 = vmax.f32 %v898_v19, 0.0  ;;  %v902_v28 = vadd.f32 -3.0, %v448_v20  ;;  %v443_v34 = vmin.f32 %v439_v25, 1.0 }
 0x1fc   :  { %v461_v29 = vmin.f32 %v457_v22, 1.0  ;;  %v458_v0 = vmax.f32 %v904_v24, 0.0  ;;  %v446_v33 = vmin.f32 %v442_v23, 1.0 }
 0x1fd   :  { %v459_v30 = vmin.f32 %v455_v2, 1.0  ;;  %v456_v31 = vmax.f32 %v902_v28, 0.0  ;;  %v444_v35 = vmin.f32 %v440_v27, 1.0 }
 0x1fe   :  { %v462_v6 = vmin.f32 %v458_v0, 1.0  ;;  %v1222_v37 = vsub.f32 %v445_v32, %v461_v29 }
 0x1ff   :  { %v460_v36 = vmin.f32 %v456_v31, 1.0  ;;  %v1226_v38 = vsub.f32 %v443_v34, %v459_v30 }
 0x200   :  { %v1224_v1 = vsub.f32 %v446_v33, %v462_v6 }
 0x201   :  { %v1228_v39 = vsub.f32 %v444_v35, %v460_v36 }
 0x202   :  { %v468_v40 = vpack.c.bf16 %v1224_v1, %v1222_v37 }
 0x203   :  { %v467_v41 = vpack.c.bf16 %v1228_v39, %v1226_v38 }
 0x204   :  { %v472_v42 = vunpack.c.h.bf16 %v468_v40  ;;  %v471_v43 = vunpack.c.l.bf16 %v468_v40  ;;  %v542_v55 = vand.u32 %v468_v40, %v1159_v14 }
 0x205   :  { %v470_v44 = vunpack.c.h.bf16 %v467_v41  ;;  %v469_v45 = vunpack.c.l.bf16 %v467_v41 }
 0x206   :  { %v476_v46 = vsub.f32 %v1224_v1, %v472_v42  ;;  %v475_v47 = vsub.f32 %v1222_v37, %v471_v43 }
 0x207   :  { %v474_v48 = vsub.f32 %v1228_v39, %v470_v44  ;;  %v473_v49 = vsub.f32 %v1226_v38, %v469_v45 }
 0x208   :  { %v478_v50 = vpack.c.bf16 %v476_v46, %v475_v47 }
 0x209   :  { %v477_v51 = vpack.c.bf16 %v474_v48, %v473_v49 }
 0x20a   :  { %v490_v52 = vand.u32 %v478_v50, %v1159_v14  ;;  %v481_v58 = vunpack.c.l.bf16 %v478_v50  ;;  %v482_v59 = vunpack.c.h.bf16 %v478_v50 }
 0x20b   :  { %1021 = vmatprep.subr.bf16.mxu0 %v477_v51  ;;  %v479_v53 = vunpack.c.l.bf16 %v477_v51  ;;  %v480_v54 = vunpack.c.h.bf16 %v477_v51 }
 0x20c   :  { %1022 = vmatpush3.bf16.msra.mxu0 %v477_v51  ;;  %v485_v61 = vsub.f32 %v475_v47, %v481_v58  ;;  %v486_v62 = vsub.f32 %v476_v46, %v482_v59 }
 0x20d   :  { %1023 = vmatprep.subr.bf16.mxu0 %v490_v52  ;;  %v483_v56 = vsub.f32 %v473_v49, %v479_v53  ;;  %v484_v57 = vsub.f32 %v474_v48, %v480_v54 }
 0x20e   :  { %v488_v63 = vpack.c.bf16 %v486_v62, %v485_v61 }
 0x20f   :  { %v487_v60 = vpack.c.bf16 %v484_v57, %v483_v56 }
 0x210   :  { %1024 = vmatpush3.bf16.msra.mxu0 %v490_v52  ;;  %v594_v3 = vand.u32 %v488_v63, %v1159_v14 }
 0x211   :  { %1029 = vmatprep.subr.bf16.mxu0 %v467_v41 }
 0x213   :  { %1026 = vmatmul.mubr.msk.bf16.vlgmr.msra.gmra.mrb[4].mxu0 %vm59_vm2, %v1184_v26 }
 0x214   :  { %1030 = vmatpush3.bf16.msra.mxu0 %v467_v41  ;;  %1033 = vmatprep.mubr.msk.bf16.mxu0 %vm59_vm2, %v1164_v15 }
 0x215   :  { %1031 = vmatprep.subr.bf16.mxu0 %v542_v55 }
 0x218   :  { %1032 = vmatpush3.bf16.msra.mxu0 %v542_v55 }
 0x219   :  { %1037 = vmatprep.subr.bf16.mxu0 %v487_v60 }
 0x21f   :  { %1034 = vmatmul.mubr.msk.bf16.vlgmr.msra.gmra.mrb[4].mxu0 %vm59_vm2, %v1184_v26 }
 0x220   :  { %1038 = vmatpush3.bf16.msra.mxu0 %v487_v60  ;;  %1041 = vmatprep.mubr.msk.bf16.mxu0 %vm59_vm2, %v1164_v15 }
 0x221   :  { %1039 = vmatprep.subr.bf16.mxu0 %v594_v3 }
 0x224   :  { %1040 = vmatpush3.bf16.msra.mxu0 %v594_v3 }
 0x22b   :  { %1042 = vmatmul.mubr.msk.bf16.vlgmr.msra.gmra.mrb[4].mxu0 %vm59_vm2, %v1184_v26 }
 0x2fe   :  { %v1043_v4 = vpop.f32.mrb[4].mxu0 }
 0x2ff   :  { %v630_v5 = vpop.f32.mrb[5].mxu0 }
 0x300   :  { %v1044_v7 = vpop.f32.mrb[6].mxu0 }
 0x301   :  { %v650_v9 = vpack.c.bf16 %v1044_v7, %v1043_v4  ;;  %v633_v10 = vpop.f32.mrb[7].mxu0 }
 0x302   :  { %v649_v11 = vpack.c.bf16 %v633_v10, %v630_v5 }
 0x303   :  { %v653_v12 = vunpack.c.l.bf16 %v650_v9  ;;  %v654_v13 = vunpack.c.h.bf16 %v650_v9 }
 0x304   :  { %v651_v16 = vunpack.c.l.bf16 %v649_v11  ;;  %v652_v17 = vunpack.c.h.bf16 %v649_v11 }
 0x305   :  { %v657_v14 = vsub.f32 %v1043_v4, %v653_v12  ;;  %v658_v19 = vsub.f32 %v1044_v7, %v654_v13 }
 0x306   :  { %v655_v20 = vsub.f32 %v630_v5, %v651_v16  ;;  %v656_v21 = vsub.f32 %v633_v10, %v652_v17 }
 0x307   :  { %v660_v15 = vpack.c.bf16 %v658_v19, %v657_v14 }
 0x308   :  { %v659_v22 = vpack.c.bf16 %v656_v21, %v655_v20 }
 0x309   :  { %v663_v23 = vunpack.c.l.bf16 %v660_v15  ;;  %v664_v24 = vunpack.c.h.bf16 %v660_v15 }
 0x30a   :  { %v661_v25 = vunpack.c.l.bf16 %v659_v22  ;;  %v662_v26 = vunpack.c.h.bf16 %v659_v22  ;;  %1049 = vmatprep.mubr.msk.bf16.mxu1 %vm59_vm2, %v659_v22 }
 0x30b   :  { %v667_v2 = vsub.f32 %v657_v14, %v663_v23  ;;  %v668_v27 = vsub.f32 %v658_v19, %v664_v24  ;;  %1050 = vmatmul.mubr.msk.bf16.vlgmr.msra.gmra.mrb[4].mxu1 %vm59_vm2, %v660_v15 }
 0x30c   :  { %v665_v28 = vsub.f32 %v655_v20, %v661_v25  ;;  %v666_v29 = vsub.f32 %v656_v21, %v662_v26  ;;  %1054 = vmatpush3.bf16.msra.mxu1 %v1154_v8  ;;  %1057 = vmatprep.mubr.msk.bf16.mxu1 %vm59_vm2, %v649_v11 }
 0x30d   :  { %v670_v0 = vpack.c.bf16 %v668_v27, %v667_v2  ;;  %1055 = vmatprep.subr.bf16.mxu1 %v1170_v18 }
 0x30e   :  { %v669_v30 = vpack.c.bf16 %v666_v29, %v665_v28 }
 0x310   :  { %1056 = vmatpush3.bf16.msra.mxu1 %v1170_v18 }
 0x311   :  { %1061 = vmatprep.subr.bf16.mxu1 %v1154_v8 }
 0x317   :  { %1058 = vmatmul.mubr.msk.bf16.vlgmr.msra.gmra.mrb[4].mxu1 %vm59_vm2, %v650_v9 }
 0x318   :  { %1062 = vmatpush3.bf16.msra.mxu1 %v1154_v8  ;;  %1065 = vmatprep.mubr.msk.bf16.mxu1 %vm59_vm2, %v669_v30 }
 0x319   :  { %1063 = vmatprep.subr.bf16.mxu1 %v1170_v18 }
 0x31c   :  { %1064 = vmatpush3.bf16.msra.mxu1 %v1170_v18 }
 0x323   :  { %1066 = vmatmul.mubr.msk.bf16.vlgmr.msra.gmra.mrb[4].mxu1 %vm59_vm2, %v670_v0 }
 0x3f6   :  { %v1067_v31 = vpop.f32.mrb[4].mxu1 }
 0x3f7   :  { %v919_v32 = vadd.f32 -2.0, %v1067_v31  ;;  %v854_v33 = vsub.f32 %v1067_v31, %v1222_v37  ;;  %v821_v6 = vpop.f32.mrb[5].mxu1 }
 0x3f8   :  { %v917_v34 = vadd.f32 -2.0, %v821_v6  ;;  %v852_v35 = vsub.f32 %v821_v6, %v1226_v38  ;;  %v1068_v36 = vpop.f32.mrb[6].mxu1 }
 0x3f9   :  { %v846_v40 = vmax.f32 %v919_v32, 0.0  ;;  %v923_v41 = vadd.f32 -3.0, %v854_v33  ;;  %v920_v8 = vadd.f32 -2.0, %v1068_v36  ;;  %v855_v42 = vsub.f32 %v1068_v36, %v1224_v1  ;;  %v824_v43 = vpop.f32.mrb[7].mxu1 }
 0x3fa   :  { %v844_v44 = vmax.f32 %v917_v34, 0.0  ;;  %v921_v45 = vadd.f32 -3.0, %v852_v35  ;;  %v918_v18 = vadd.f32 -2.0, %v824_v43  ;;  %v853_v46 = vsub.f32 %v824_v43, %v1228_v39 }
 0x3fb   :  { %v862_v47 = vmax.f32 %v923_v41, 0.0  ;;  %v847_v48 = vmax.f32 %v920_v8, 0.0  ;;  %v924_v49 = vadd.f32 -3.0, %v855_v42  ;;  %v850_v52 = vmin.f32 %v846_v40, 1.0 }
 0x3fc   :  { %v860_v37 = vmax.f32 %v921_v45, 0.0  ;;  %v845_v50 = vmax.f32 %v918_v18, 0.0  ;;  %v922_v51 = vadd.f32 -3.0, %v853_v46  ;;  %v848_v54 = vmin.f32 %v844_v44, 1.0 }
 0x3fd   :  { %v866_v38 = vmin.f32 %v862_v47, 1.0  ;;  %v863_v53 = vmax.f32 %v924_v49, 0.0  ;;  %v851_v1 = vmin.f32 %v847_v48, 1.0 }
 0x3fe   :  { %v864_v55 = vmin.f32 %v860_v37, 1.0  ;;  %v861_v56 = vmax.f32 %v922_v51, 0.0  ;;  %v849_v60 = vmin.f32 %v845_v50, 1.0 }
 0x3ff   :  { %v870_v57 = vsub.f32 %v850_v52, %v866_v38  ;;  %v867_v58 = vmin.f32 %v863_v53, 1.0 }
 0x400   :  { %v868_v59 = vsub.f32 %v848_v54, %v864_v55  ;;  %v865_v61 = vmin.f32 %v861_v56, 1.0 }
 0x401   :  { %874 = vst.msk [vmem:[%s1286_s3 + $0x10] sm:$0xff] %vm59_vm2, %v870_v57  ;;  %v871_v39 = vsub.f32 %v851_v1, %v867_v58 }
 0x402   :  { %872 = vst.msk [vmem:[%s1286_s3] sm:$0xff] %vm59_vm2, %v868_v59  ;;  %v869_v62 = vsub.f32 %v849_v60, %v865_v61 }
 0x403   :  { %876 = vst.msk [vmem:[%s1286_s3 + $0x18] sm:$0x1] %vm875_vm3, %v871_v39 }
 0x404   :  { %873 = vst.msk [vmem:[%s1286_s3 + $0x8] sm:$0xff] %vm59_vm2, %v869_v62 }

</bundles_post_ra>
